<compile_context>
chip_gen: v6e
topology: v6e:2x2x1
jax: 0.10.0
libtpu: 0.0.40
codegen_flags: <defaults>
</compile_context>

<pallas_src>
import functools

import jax
import jax.numpy as jnp
from jax.experimental import pallas as pl
from jax.experimental.pallas import tpu as pltpu


def meetconv_kernel(x_ref, dlt_t_ref, dltinv_t_ref, filt_ref, bias_ref, o_ref):
    """One tile of TB batch elements per grid step.

    x_ref:        (TB*C_in, N)     activations, batch-major rows (b, c), MXU dtype
    dlt_t_ref:    (N, N)           DLT^T        (grid-invariant)
    dltinv_t_ref: (N, N)           DLT_inv^T    (grid-invariant)
    filt_ref:     (C_in, C_out, N) f32          (grid-invariant)
    bias_ref:     (TB*C_out, N)    f32, bias pre-tiled to rows (b, o) (grid-invariant)
    o_ref:        (TB*C_out, N)    output, batch-major rows (b, o)
    """
    c_in, c_out, n = filt_ref.shape
    tb = x_ref.shape[0] // c_in

    # (1) Forward lattice transform on the MXU, all TB*C_in rows at once:
    #       xhat[(b,c), m] = sum_l x[b,c,l] * DLT[m,l]  ==  x @ DLT^T
    xhat = jnp.dot(x_ref[...], dlt_t_ref[...],
                   preferred_element_type=jnp.float32)       # (TB*C_in, N) f32
    xhat = xhat.reshape(tb, c_in, n)

    # (2) Per-node channel mixing on the VPU (f32), statically unrolled over
    #     the small C_in so only a (TB, C_out, N) accumulator is live.
    y = jnp.zeros((tb, c_out, n), dtype=jnp.float32)
    for c in range(c_in):
        y = y + filt_ref[c][None, :, :] * xhat[:, c:c + 1, :]

    # (3) Inverse lattice transform on the MXU + bias:
    #       out[(b,o), n] = sum_m y[b,o,m] * DLT_inv[n,m]  ==  y @ DLT_inv^T
    y2 = y.reshape(tb * c_out, n).astype(dltinv_t_ref.dtype)
    out = jnp.dot(y2, dltinv_t_ref[...],
                  preferred_element_type=jnp.float32)         # (TB*C_out, N) f32
    o_ref[...] = (out + bias_ref[...]).astype(o_ref.dtype)


@functools.partial(jax.jit, static_argnames=("tb",))
def meet_conv(x, dlt_t, dltinv_t, filt, bias, *, tb=32):
    """out[b,o,n] = sum_{c,m,l} DLT_inv[n,m] filter[c,o,m] DLT[m,l] x[b,c,l] + bias[o,n].

    Args:
      x:        (B, C_in, N)
      dlt_t:    (N, N)  pre-transposed DLT^T, already in the MXU dtype (bf16 rec.)
      dltinv_t: (N, N)  pre-transposed DLT_inv^T, same dtype as dlt_t
      filt:     (C_in, C_out, N) f32
      bias:     (C_out, N) f32
      tb:       batch tile (multiple of 8). tb*C_in >= 128 fills the v5e MXU,
                tb*C_in >= 256 the v6e/v7x MXU.
    """
    B, C_in, N = x.shape
    C_in_f, C_out, N_f = filt.shape
    assert (C_in_f, N_f) == (C_in, N), (filt.shape, x.shape)
    assert dlt_t.shape == (N, N) and dltinv_t.shape == (N, N)
    assert bias.shape == (C_out, N)
    assert tb % 8 == 0 and tb > 0

    out_dtype = x.dtype
    mxu_dtype = dlt_t.dtype

    # Shrink the batch tile for tiny B (keep it a multiple of 8 sublanes).
    tb = min(tb, max(8, ((B + 7) // 8) * 8))
    n_tiles = pl.cdiv(B, tb)
    b_pad = n_tiles * tb

    # Stream activations in the MXU dtype; fold batch-major (free reshape).
    x2 = x.astype(mxu_dtype)
    if b_pad != B:
        x2 = jnp.pad(x2, ((0, b_pad - B), (0, 0), (0, 0)))
    x2 = x2.reshape(b_pad * C_in, N)

    # Pre-tile bias to batch-major rows (b, o): row b*C_out + o holds bias[o].
    bias_tile = jnp.tile(bias.astype(jnp.float32), (tb, 1))   # (tb*C_out, N)

    out2 = pl.pallas_call(
        meetconv_kernel,
        out_shape=jax.ShapeDtypeStruct((b_pad * C_out, N), out_dtype),
        grid_spec=pltpu.PrefetchScalarGridSpec(
            num_scalar_prefetch=0,
            grid=(n_tiles,),
            in_specs=[
                # Activations: one dense (tb*C_in, N) slab per step.
                pl.BlockSpec((tb * C_in, N), lambda b: (b, 0)),
                # Grid-invariant constants (DMA'd once, revisited thereafter).
                # TODO(synk): for very large N on v7x (64 MiB VMEM/core, constants
                # duplicated per core) single-buffer these (pl.Buffered(1)) and/or
                # add an "arbitrary" n/m tiling axis with an f32 accumulator.
                pl.BlockSpec((N, N), lambda b: (0, 0)),               # DLT^T
                pl.BlockSpec((N, N), lambda b: (0, 0)),               # DLT_inv^T
                pl.BlockSpec((C_in, C_out, N), lambda b: (0, 0, 0)),  # filter
                pl.BlockSpec((tb * C_out, N), lambda b: (0, 0)),      # tiled bias
            ],
            out_specs=pl.BlockSpec((tb * C_out, N), lambda b: (b, 0)),
        ),
        compiler_params=pltpu.CompilerParams(
            # Batch tiles are independent -> shard across TensorCores (v7x megacore).
            dimension_semantics=("parallel",),
            vmem_limit_bytes=48 * 1024 * 1024,
        ),
    )(x2, dlt_t, dltinv_t, filt, bias_tile)

    return out2.reshape(b_pad, C_out, N)[:B]


if __name__ == "__main__":
    # Small but MXU/lane-friendly shapes: batch=48 (exercises the padded last
    # batch tile), C_in=C_out=4, lattice size N=128.
    B, C_in, C_out, N = 48, 4, 4, 128
    key = jax.random.PRNGKey(0)
    k1, k2, k3, k4, k5 = jax.random.split(key, 5)

    x = jax.random.normal(k1, (B, C_in, N), dtype=jnp.float32)

    # Synthetic lattice transforms (the module gets these from the lattice L).
    dlt = jax.random.normal(k2, (N, N), dtype=jnp.float32) / jnp.sqrt(N)
    dlt_inv = jax.random.normal(k3, (N, N), dtype=jnp.float32) / jnp.sqrt(N)

    # kaiming_normal_(a=0.01)-style init (fan_in = C_out*N for filter, N for bias).
    gain = (2.0 / (1.0 + 0.01 ** 2)) ** 0.5
    filt = jax.random.normal(k4, (C_in, C_out, N), dtype=jnp.float32) * (gain / (C_out * N) ** 0.5)
    bias = jax.random.normal(k5, (C_out, N), dtype=jnp.float32) * (gain / N ** 0.5)

    # Fixed lattice constants: pre-transpose + pre-cast ONCE ("module init"),
    # not on every forward call.
    dlt_t = jnp.transpose(dlt).astype(jnp.bfloat16)
    dltinv_t = jnp.transpose(dlt_inv).astype(jnp.bfloat16)

    # TODO(synk): the `irreducibles` mask branch of the PyTorch forward references
    # an undefined global (`irreducibles.empty()`); only the main einsum path is
    # implemented here.

    out = jax.block_until_ready(meet_conv(x, dlt_t, dltinv_t, filt, bias, tb=32))

    # Pure-JAX f32 reference: 'nm,com,ml,bcl->bon' + bias.  bf16 MXU operands
    # (with f32 accumulation) -> compare with a bf16-appropriate tolerance.
    ref = jnp.einsum("nm,com,ml,bcl->bon", dlt_inv, filt, dlt, x) + bias[None]
    assert out.shape == (B, C_out, N), out.shape
    err = float(jnp.max(jnp.abs(out - ref)))
    assert jnp.allclose(out, ref, rtol=1e-2, atol=1e-2), err

    print("KERNEL_OK")
</pallas_src>

<mosaic_0001>
module attributes {stable_mosaic.version = 11 : i64} {
  func.func @meetconv_kernel(%arg0: i32, %arg1: memref<128x128xbf16, #tpu.memory_space<vmem>>, %arg2: memref<128x128xbf16, #tpu.memory_space<vmem>>, %arg3: memref<128x128xbf16, #tpu.memory_space<vmem>>, %arg4: memref<4x4x128xf32, #tpu.memory_space<vmem>>, %arg5: memref<128x128xf32, #tpu.memory_space<vmem>>, %arg6: memref<128x128xf32, #tpu.memory_space<vmem>>) attributes {dimension_semantics = [#tpu.dimension_semantics<parallel>], iteration_bounds = array<i64: 2>, scalar_prefetch = 0 : i64, scratch_operands = 0 : i64, tpu.core_type = #tpu.core_type<tc>, window_params = [{transform_indices = @transform_0, window_bounds = array<i64: 128, 128>}, {pipeline_mode = #tpu.pipeline_mode<synchronous>, transform_indices = @transform_1, window_bounds = array<i64: 128, 128>}, {pipeline_mode = #tpu.pipeline_mode<synchronous>, transform_indices = @transform_2, window_bounds = array<i64: 128, 128>}, {pipeline_mode = #tpu.pipeline_mode<synchronous>, transform_indices = @transform_3, window_bounds = array<i64: 4, 4, 128>}, {pipeline_mode = #tpu.pipeline_mode<synchronous>, transform_indices = @transform_4, window_bounds = array<i64: 128, 128>}, {transform_indices = @transform_5, window_bounds = array<i64: 128, 128>}]} {
    %c0 = arith.constant 0 : index
    %c0_0 = arith.constant 0 : index
    %0 = vector.load %arg1[%c0, %c0_0] : memref<128x128xbf16, #tpu.memory_space<vmem>>, vector<128x128xbf16>
    %c0_1 = arith.constant 0 : index
    %c0_2 = arith.constant 0 : index
    %1 = vector.load %arg2[%c0_1, %c0_2] : memref<128x128xbf16, #tpu.memory_space<vmem>>, vector<128x128xbf16>
    %cst = arith.constant dense<0.000000e+00> : vector<128x128xf32>
    %2 = tpu.matmul %0, %1, %cst {dimension_numbers = #tpu.dot_dimension_numbers<[1], [0], [0], [1], [0, 0, 1, 1], [], []>} : vector<128x128xbf16>, vector<128x128xbf16>, vector<128x128xf32> -> vector<128x128xf32>
    %3 = vector.shape_cast %2 : vector<128x128xf32> to vector<32x4x128xf32>
    %cst_3 = arith.constant 0.000000e+00 : f32
    %4 = vector.broadcast %cst_3 : f32 to vector<32x4x128xf32>
    %c0_4 = arith.constant 0 : index
    %c0_5 = arith.constant 0 : index
    %c0_6 = arith.constant 0 : index
    %5 = vector.load %arg4[%c0_4, %c0_5, %c0_6] : memref<4x4x128xf32, #tpu.memory_space<vmem>>, vector<1x4x128xf32>
    %6 = vector.shape_cast %5 : vector<1x4x128xf32> to vector<4x128xf32>
    %7 = vector.shape_cast %6 : vector<4x128xf32> to vector<1x4x128xf32>
    %8 = vector.extract_strided_slice %3 {offsets = [0, 0, 0], sizes = [32, 1, 128], strides = [1, 1, 1]} : vector<32x4x128xf32> to vector<32x1x128xf32>
    %9 = vector.broadcast %7 : vector<1x4x128xf32> to vector<32x4x128xf32>
    %10 = vector.broadcast %8 : vector<32x1x128xf32> to vector<32x4x128xf32>
    %11 = arith.mulf %9, %10 : vector<32x4x128xf32>
    %12 = arith.addf %4, %11 : vector<32x4x128xf32>
    %c1 = arith.constant 1 : index
    %c0_7 = arith.constant 0 : index
    %c0_8 = arith.constant 0 : index
    %13 = vector.load %arg4[%c1, %c0_7, %c0_8] : memref<4x4x128xf32, #tpu.memory_space<vmem>>, vector<1x4x128xf32>
    %14 = vector.shape_cast %13 : vector<1x4x128xf32> to vector<4x128xf32>
    %15 = vector.shape_cast %14 : vector<4x128xf32> to vector<1x4x128xf32>
    %16 = vector.extract_strided_slice %3 {offsets = [0, 1, 0], sizes = [32, 1, 128], strides = [1, 1, 1]} : vector<32x4x128xf32> to vector<32x1x128xf32>
    %17 = vector.broadcast %15 : vector<1x4x128xf32> to vector<32x4x128xf32>
    %18 = vector.broadcast %16 : vector<32x1x128xf32> to vector<32x4x128xf32>
    %19 = arith.mulf %17, %18 : vector<32x4x128xf32>
    %20 = arith.addf %12, %19 : vector<32x4x128xf32>
    %c2 = arith.constant 2 : index
    %c0_9 = arith.constant 0 : index
    %c0_10 = arith.constant 0 : index
    %21 = vector.load %arg4[%c2, %c0_9, %c0_10] : memref<4x4x128xf32, #tpu.memory_space<vmem>>, vector<1x4x128xf32>
    %22 = vector.shape_cast %21 : vector<1x4x128xf32> to vector<4x128xf32>
    %23 = vector.shape_cast %22 : vector<4x128xf32> to vector<1x4x128xf32>
    %24 = vector.extract_strided_slice %3 {offsets = [0, 2, 0], sizes = [32, 1, 128], strides = [1, 1, 1]} : vector<32x4x128xf32> to vector<32x1x128xf32>
    %25 = vector.broadcast %23 : vector<1x4x128xf32> to vector<32x4x128xf32>
    %26 = vector.broadcast %24 : vector<32x1x128xf32> to vector<32x4x128xf32>
    %27 = arith.mulf %25, %26 : vector<32x4x128xf32>
    %28 = arith.addf %20, %27 : vector<32x4x128xf32>
    %c3 = arith.constant 3 : index
    %c0_11 = arith.constant 0 : index
    %c0_12 = arith.constant 0 : index
    %29 = vector.load %arg4[%c3, %c0_11, %c0_12] : memref<4x4x128xf32, #tpu.memory_space<vmem>>, vector<1x4x128xf32>
    %30 = vector.shape_cast %29 : vector<1x4x128xf32> to vector<4x128xf32>
    %31 = vector.shape_cast %30 : vector<4x128xf32> to vector<1x4x128xf32>
    %32 = vector.extract_strided_slice %3 {offsets = [0, 3, 0], sizes = [32, 1, 128], strides = [1, 1, 1]} : vector<32x4x128xf32> to vector<32x1x128xf32>
    %33 = vector.broadcast %31 : vector<1x4x128xf32> to vector<32x4x128xf32>
    %34 = vector.broadcast %32 : vector<32x1x128xf32> to vector<32x4x128xf32>
    %35 = arith.mulf %33, %34 : vector<32x4x128xf32>
    %36 = arith.addf %28, %35 : vector<32x4x128xf32>
    %37 = vector.shape_cast %36 : vector<32x4x128xf32> to vector<128x128xf32>
    %38 = arith.truncf %37 : vector<128x128xf32> to vector<128x128xbf16>
    %c0_13 = arith.constant 0 : index
    %c0_14 = arith.constant 0 : index
    %39 = vector.load %arg3[%c0_13, %c0_14] : memref<128x128xbf16, #tpu.memory_space<vmem>>, vector<128x128xbf16>
    %cst_15 = arith.constant dense<0.000000e+00> : vector<128x128xf32>
    %40 = tpu.matmul %38, %39, %cst_15 {dimension_numbers = #tpu.dot_dimension_numbers<[1], [0], [0], [1], [0, 0, 1, 1], [], []>} : vector<128x128xbf16>, vector<128x128xbf16>, vector<128x128xf32> -> vector<128x128xf32>
    %c0_16 = arith.constant 0 : index
    %c0_17 = arith.constant 0 : index
    %41 = vector.load %arg5[%c0_16, %c0_17] : memref<128x128xf32, #tpu.memory_space<vmem>>, vector<128x128xf32>
    %42 = arith.addf %40, %41 : vector<128x128xf32>
    %c0_18 = arith.constant 0 : index
    %c0_19 = arith.constant 0 : index
    %43 = vector.load %arg6[%c0_18, %c0_19] : memref<128x128xf32, #tpu.memory_space<vmem>>, vector<128x128xf32>
    tpu.vector_store %arg6[%c0_18, %c0_19], %42 {strides = array<i32>} : memref<128x128xf32, #tpu.memory_space<vmem>>, vector<128x128xf32>,
    return
  }
  func.func @transform_0(%arg0: i32) -> (i32, i32) {
    %c0_i32 = arith.constant 0 : i32
    %c0_i32_0 = arith.constant 0 : i32
    return %arg0, %c0_i32 : i32, i32
  }
  func.func @transform_1(%arg0: i32) -> (i32, i32) {
    %c0_i32 = arith.constant 0 : i32
    %c0_i32_0 = arith.constant 0 : i32
    %c0_i32_1 = arith.constant 0 : i32
    return %c0_i32, %c0_i32_0 : i32, i32
  }
  func.func @transform_2(%arg0: i32) -> (i32, i32) {
    %c0_i32 = arith.constant 0 : i32
    %c0_i32_0 = arith.constant 0 : i32
    %c0_i32_1 = arith.constant 0 : i32
    return %c0_i32, %c0_i32_0 : i32, i32
  }
  func.func @transform_3(%arg0: i32) -> (i32, i32, i32) {
    %c0_i32 = arith.constant 0 : i32
    %c0_i32_0 = arith.constant 0 : i32
    %c0_i32_1 = arith.constant 0 : i32
    %c0_i32_2 = arith.constant 0 : i32
    return %c0_i32, %c0_i32_0, %c0_i32_1 : i32, i32, i32
  }
  func.func @transform_4(%arg0: i32) -> (i32, i32) {
    %c0_i32 = arith.constant 0 : i32
    %c0_i32_0 = arith.constant 0 : i32
    %c0_i32_1 = arith.constant 0 : i32
    return %c0_i32, %c0_i32_0 : i32, i32
  }
  func.func @transform_5(%arg0: i32) -> (i32, i32) {
    %c0_i32 = arith.constant 0 : i32
    %c0_i32_0 = arith.constant 0 : i32
    return %arg0, %c0_i32 : i32, i32
  }
}

</mosaic_0001>

<bundles_post_ra>
// kernel: meet_conv.1
= control target key start
LH: loop header
LB: loop body
LE: loop exit
PB: predicated region body
PF: predicated region fallthrough
CT: control target
= control target key end

     0   :  { %s1802_s18 = smov 0   ;;  %s2648_s0 = inlined_call_operand.vmem [shape: bf16[256,128], index: 0, kind: input, shape index: {}]   ;;  %s2649_s1 = inlined_call_operand.vmem [shape: bf16[128,128], index: 1, kind: input, shape index: {}]   ;;  %s2650_s2 = inlined_call_operand.vmem [shape: bf16[128,128], index: 2, kind: input, shape index: {}]   ;;  %s2651_s3 = inlined_call_operand.vmem [shape: f32[4,4,128], index: 3, kind: input, shape index: {}]   ;;  %s2652_s4 = inlined_call_operand.vmem [shape: f32[128,128], index: 4, kind: input, shape index: {}]   ;;  %s2653_s5 = inlined_call_operand.vmem [shape: f32[256,128], index: 5, kind: output, shape index: {}]  }
   0x1 LB: > { %s1598_s19 = sadd.s32 4294967295, %s1770_s18   ;;  %p1602_p0 = scmp.ge.s32.totalorder %s1770_s18, 1  ;;  %s1770_s18 = sphi %s1802_s18, %s15_s18  }
   0x2   : > { %p188_p1 = scmp.lt.s32.totalorder %s1770_s18, 3 }
   0x4   : > { %p189_p2 = pnand %p1602_p0, %p188_p1 }
   0x6   : > { %192 = sbr.rel (%p189_p2) target bundleno = 549 (0x225), region = 40 }
   0xb   : > { %v1740_v0 = vld [vmem:[%s2649_s1 + $0x38] sm:$0xff]   ;;  %s1603_s22 = sshll.u32 %s1598_s19, 4  ;;  %v1741_v1 = vld [vmem:[%s2649_s1 + $0x30] sm:$0xff]   ;;  %v1742_v2 = vld [vmem:[%s2649_s1 + $0x28] sm:$0xff]   ;;  %v503_v24 = vlaneseq }
   0xc   : > { %p217_p3 = scmp.lt.s32.totalorder %s1603_s22, 31  ;;  %1668 = vmatprep.subr.bf16.mxu0 %v1740_v0  ;;  %v1743_v3 = vld [vmem:[%s2649_s1 + $0x20] sm:$0xff]   ;;  %v1744_v5 = vld [vmem:[%s2649_s1 + $0x18] sm:$0xff]   ;;  %v1745_v6 = vld [vmem:[%s2649_s1 + $0x10] sm:$0xff]  }
   0xd   : > { %1669 = vmatpush3.bf16.msra.mxu0 %v1740_v0  ;;  %v1756_v7 = vld [vmem:[%s2650_s2 + $0x38] sm:$0xff]   ;;  %v1757_v8 = vld [vmem:[%s2650_s2 + $0x30] sm:$0xff]   ;;  %v1746_v9 = vld [vmem:[%s2649_s1 + $0x8] sm:$0xff]   ;;  %v504_v25 = vshrl.u32 %v503_v24, 7 }
   0xe   : > { %s2717_s22 = smov (!%p217_p3, %s1603_s22), 31  ;;  %1670 = vmatprep.subr.bf16.mxu0 %v1741_v1  ;;  %1700 = vmatprep.subr.bf16.mxu1 %v1756_v7  ;;  %v1747_v10 = vld [vmem:[%s2649_s1] sm:$0xff]   ;;  %v1758_v18 = vld [vmem:[%s2650_s2 + $0x28] sm:$0xff]   ;;  %v1760_v20 = vld [vmem:[%s2650_s2 + $0x18] sm:$0xff]  }
   0xf   : > { %s1604_s27 = sshll.u32 %s2717_s22, 2  ;;  %1701 = vmatpush3.bf16.msra.mxu1 %v1756_v7  ;;  %v1759_v19 = vld [vmem:[%s2650_s2 + $0x20] sm:$0xff]   ;;  %v1761_v21 = vld [vmem:[%s2650_s2 + $0x10] sm:$0xff]   ;;  %v1762_v22 = vld [vmem:[%s2650_s2 + $0x8] sm:$0xff]   ;;  %v1874_v26 = vsub.s32 0, %v504_v25  ;;  %v1876_v27 = vsub.s32 1, %v504_v25 }
  0x10   : > { %s1825_s30 = scalar_lea.vmem %s2648_s0, %s1604_s27  ;;  %1702 = vmatprep.subr.bf16.mxu1 %v1757_v8  ;;  %v1763_v23 = vld [vmem:[%s2650_s2] sm:$0xff]   ;;  %v1878_v28 = vsub.s32 2, %v504_v25  ;;  %v1880_v29 = vsub.s32 3, %v504_v25  ;;  %v1901_v35 = vld [vmem:[%s2651_s3 + $0x8] sm:$0xf]  ;;  %s1606_s17 = sshll.u32 %s2717_s22, 3 }
  0x11   : > { %1671 = vmatpush3.bf16.msra.mxu0 %v1741_v1  ;;  %v1748_v4 = vld [vmem:[%s1825_s30] sm:$0xff]   ;;  %v1749_v11 = vld [vmem:[%s1825_s30 + $0x8] sm:$0xff]   ;;  %v1750_v12 = vld [vmem:[%s1825_s30 + $0x10] sm:$0xff]   ;;  %s2582_s24 = scalar_lea.vmem %s2653_s5, %s1606_s17 }
  0x12   : > { %1672 = vmatprep.subr.bf16.mxu0 %v1742_v2  ;;  %1684 = vmatprep.mubr.bf16.mxu0 %v1748_v4  ;;  %v1751_v13 = vld [vmem:[%s1825_s30 + $0x18] sm:$0xff]   ;;  %v1752_v14 = vld [vmem:[%s1825_s30 + $0x20] sm:$0xff]   ;;  %v1753_v15 = vld [vmem:[%s1825_s30 + $0x28] sm:$0xff]  }
  0x13   : > { %1703 = vmatpush3.bf16.msra.mxu1 %v1757_v8  ;;  %v1754_v16 = vld [vmem:[%s1825_s30 + $0x30] sm:$0xff]   ;;  %v1755_v17 = vld [vmem:[%s1825_s30 + $0x38] sm:$0xff]   ;;  %v1887_v31 = vld [vmem:[%s2651_s3] sm:$0xf] }
  0x14   : > { %1704 = vmatprep.subr.bf16.mxu1 %v1758_v18  ;;  %v1894_v33 = vld [vmem:[%s2651_s3 + $0x4] sm:$0xf] }
  0x15   : > { %1673 = vmatpush3.bf16.msra.mxu0 %v1742_v2 }
  0x16   : > { %1674 = vmatprep.subr.bf16.mxu0 %v1743_v3 }
  0x17   : > { %1705 = vmatpush3.bf16.msra.mxu1 %v1758_v18 }
  0x18   : > { %1706 = vmatprep.subr.bf16.mxu1 %v1759_v19 }
  0x19   : > { %1675 = vmatpush3.bf16.msra.mxu0 %v1743_v3 }
  0x1a   : > { %1676 = vmatprep.subr.bf16.mxu0 %v1744_v5 }
  0x1b   : > { %1707 = vmatpush3.bf16.msra.mxu1 %v1759_v19 }
  0x1c   : > { %1708 = vmatprep.subr.bf16.mxu1 %v1760_v20 }
  0x1d   : > { %1677 = vmatpush3.bf16.msra.mxu0 %v1744_v5 }
  0x1e   : > { %1678 = vmatprep.subr.bf16.mxu0 %v1745_v6 }
  0x1f   : > { %1709 = vmatpush3.bf16.msra.mxu1 %v1760_v20 }
  0x20   : > { %1710 = vmatprep.subr.bf16.mxu1 %v1761_v21 }
  0x21   : > { %1679 = vmatpush3.bf16.msra.mxu0 %v1745_v6 }
  0x22   : > { %1680 = vmatprep.subr.bf16.mxu0 %v1746_v9 }
  0x23   : > { %1711 = vmatpush3.bf16.msra.mxu1 %v1761_v21 }
  0x24   : > { %1712 = vmatprep.subr.bf16.mxu1 %v1762_v22 }
  0x25   : > { %1681 = vmatpush3.bf16.msra.mxu0 %v1746_v9 }
  0x26   : > { %1682 = vmatprep.subr.bf16.mxu0 %v1747_v10 }
  0x27   : > { %1713 = vmatpush3.bf16.msra.mxu1 %v1762_v22 }
  0x28   : > { %1714 = vmatprep.subr.bf16.mxu1 %v1763_v23 }
  0x29   : > { %1683 = vmatpush3.bf16.msra.mxu0 %v1747_v10 }
  0x2b   : > { %1715 = vmatpush3.bf16.msra.mxu1 %v1763_v23 }
  0x2c   : > { %1685 = vmatmul.mubr.bf16.vlgmr.msra.gmra.mxu0 %v1749_v11 }
  0x2d   : > { %1688 = vmatprep.mubr.bf16.mxu0 %v1750_v12 }
  0x34   : > { %1689 = vmatmul.mubr.bf16.gmra.mxu0 %v1751_v13 }
  0x35   : > { %1692 = vmatprep.mubr.bf16.mxu0 %v1752_v14 }
  0x3c   : > { %1693 = vmatmul.mubr.bf16.gmra.mxu0 %v1753_v15 }
  0x3d   : > { %1696 = vmatprep.mubr.bf16.mxu0 %v1754_v16 }
  0x44   : > { %1697 = vmatmul.mubr.bf16.gmra.mxu0 %v1755_v17 }
  0xec   : > { %v1882_v30 = vpop.f32.mrf.mxu0 }
  0xed   : > { %v522_v32 = vrot.slane %v1882_v30, %v1874_v26  ;;  %v716_v34 = vrot.slane %v1882_v30, %v1876_v27  ;;  %v910_v36 = vrot.slane %v1882_v30, %v1878_v28  ;;  %v1909_v38 = vcombine.high %v1882_v30, %v1882_v30 }
  0xee   : > { %v1905_v37 = vpop.f32.mrf.mxu0 }
  0xef   : > { %v1912_v39 = vmul.f32 %v522_v32, %v1887_v31  ;;  %v1918_v41 = vcombine.high %v1905_v37, %v1905_v37  ;;  %v1921_v42 = vmul.f32 %v1894_v33, %v716_v34  ;;  %v1924_v43 = vmul.f32 %v1901_v35, %v910_v36 }
  0xf0   : > { %v506_v44 = vrot.slane %v1905_v37, %v1874_v26  ;;  %v1930_v46 = vpop.f32.mrf.mxu0 }
  0xf1   : > { %v530_v48 = vrot.slane %v1930_v46, %v1874_v26  ;;  %v724_v49 = vrot.slane %v1930_v46, %v1876_v27  ;;  %v918_v50 = vrot.slane %v1930_v46, %v1878_v28  ;;  %v1942_v51 = vcombine.high %v1930_v46, %v1930_v46 }
  0xf2   : > { %v1946_v53 = vpop.f32.mrf.mxu0  ;;  %v510_v54 = vrot.slane %v1918_v41, %v1874_v26  ;;  %v1960_v58 = vmul.f32 %v506_v44, %v1887_v31 }
  0xf3   : > { %v1953_v56 = vmul.f32 %v530_v48, %v1887_v31  ;;  %v1957_v57 = vcombine.high %v1946_v53, %v1946_v53  ;;  %v1965_v60 = vmul.f32 %v1894_v33, %v724_v49  ;;  %v1968_v61 = vmul.f32 %v1901_v35, %v918_v50 }
  0xf4   : > { %v514_v62 = vrot.slane %v1946_v53, %v1874_v26  ;;  %v1974_v0 = vpop.f32.mrf.mxu0  ;;  %v1995_v9 = vmul.f32 %v510_v54, %v1887_v31 }
  0xf5   : > { %v554_v2 = vrot.slane %v1974_v0, %v1874_v26  ;;  %v748_v3 = vrot.slane %v1974_v0, %v1876_v27  ;;  %v942_v4 = vrot.slane %v1974_v0, %v1878_v28  ;;  %v1986_v5 = vcombine.high %v1974_v0, %v1974_v0 }
  0xf6   : > { %v1990_v7 = vpop.f32.mrf.mxu0  ;;  %v2004_v12 = vmul.f32 %v514_v62, %v1887_v31 }
  0xf7   : > { %v1998_v10 = vmul.f32 %v554_v2, %v1887_v31  ;;  %v2001_v11 = vmul.f32 %v1894_v33, %v748_v3  ;;  %v2009_v14 = vmul.f32 %v1901_v35, %v942_v4  ;;  %v538_v15 = vrot.slane %v1990_v7, %v1874_v26 }
  0xf8   : > { %v732_v16 = vrot.slane %v1990_v7, %v1876_v27  ;;  %v926_v17 = vrot.slane %v1990_v7, %v1878_v28  ;;  %v2017_v18 = vpop.f32.mrf.mxu0  ;;  %v2021_v19 = vcombine.high %v1990_v7, %v1990_v7 }
  0xf9   : > { %v562_v20 = vrot.slane %v2017_v18, %v1874_v26  ;;  %v756_v21 = vrot.slane %v2017_v18, %v1876_v27  ;;  %v950_v22 = vrot.slane %v2017_v18, %v1878_v28  ;;  %v2030_v23 = vmul.f32 %v538_v15, %v1887_v31 }
  0xfa   : > { %v2033_v24 = vmul.f32 %v1894_v33, %v732_v16  ;;  %v2039_v32 = vcombine.high %v2017_v18, %v2017_v18  ;;  %v2041_v34 = vpop.f32.mrf.mxu0  ;;  %v2044_v36 = vmul.f32 %v1901_v35, %v926_v17 }
  0xfb   : > { %v2047_v44 = vmul.f32 %v562_v20, %v1887_v31  ;;  %v2050_v48 = vmul.f32 %v1894_v33, %v756_v21  ;;  %v2055_v50 = vmul.f32 %v1901_v35, %v950_v22  ;;  %v546_v54 = vrot.slane %v2041_v34, %v1874_v26 }
  0xfc   : > { %v740_v62 = vrot.slane %v2041_v34, %v1876_v27  ;;  %v934_v2 = vrot.slane %v2041_v34, %v1878_v28  ;;  %v2063_v3 = vpop.f32.mrf.mxu0  ;;  %v2067_v4 = vcombine.high %v2041_v34, %v2041_v34 }
  0xfd   : > { %2660 = vst [vmem:[#allocation2_spill] sm:$0xff] %v2063_v3  ;;  %v586_v15 = vrot.slane %v2063_v3, %v1874_v26  ;;  %v780_v16 = vrot.slane %v2063_v3, %v1876_v27  ;;  %v974_v17 = vrot.slane %v2063_v3, %v1878_v28  ;;  %v2076_v20 = vmul.f32 %v546_v54, %v1887_v31 }
  0xfe   : > { %v2079_v21 = vmul.f32 %v1894_v33, %v740_v62  ;;  %v2085_v49 = vcombine.high %v2063_v3, %v2063_v3  ;;  %v2087_v6 = vpop.f32.mrf.mxu0  ;;  %v2090_v25 = vmul.f32 %v1901_v35, %v934_v2 }
  0xff   : > { %2662 = vst [vmem:[#allocation4_spill] sm:$0xff] %v2087_v6  ;;  %v2093_v52 = vmul.f32 %v586_v15, %v1887_v31  ;;  %v2096_v54 = vmul.f32 %v1894_v33, %v780_v16  ;;  %v2101_v22 = vmul.f32 %v1901_v35, %v974_v17  ;;  %v570_v40 = vrot.slane %v2087_v6, %v1874_v26 }
 0x100   : > { %2661 = vst [vmem:[#allocation3_spill] sm:$0xff] %v2085_v49  ;;  %v764_v55 = vrot.slane %v2087_v6, %v1876_v27  ;;  %v958_v2 = vrot.slane %v2087_v6, %v1878_v28  ;;  %v2109_v15 = vpop.f32.mrf.mxu0  ;;  %v2113_v16 = vcombine.high %v2087_v6, %v2087_v6 }
 0x101   : > { %2663 = vst [vmem:[#allocation5_spill] sm:$0xff] %v2093_v52  ;;  %2664 = vst [vmem:[#allocation6_spill] sm:$0xff] %v2096_v54  ;;  %v594_v62 = vrot.slane %v2109_v15, %v1874_v26  ;;  %v788_v17 = vrot.slane %v2109_v15, %v1876_v27  ;;  %v982_v1 = vrot.slane %v2109_v15, %v1878_v28 }
 0x102   : > { %2665 = vst [vmem:[#allocation7_spill] sm:$0xff] %v2101_v22  ;;  %2666 = vst [vmem:[#allocation8_spill] sm:$0xff] %v2109_v15  ;;  %v2122_v47 = vmul.f32 %v570_v40, %v1887_v31  ;;  %v2125_v13 = vmul.f32 %v1894_v33, %v764_v55  ;;  %v2131_v59 = vcombine.high %v2109_v15, %v2109_v15  ;;  %v2133_v45 = vpop.f32.mrf.mxu0 }
 0x103   : > { %2669 = vst [vmem:[#allocation11_spill] sm:$0xff] %v2133_v45  ;;  %v2136_v8 = vmul.f32 %v1901_v35, %v958_v2  ;;  %v2139_v3 = vmul.f32 %v594_v62, %v1887_v31  ;;  %v2142_v40 = vmul.f32 %v1894_v33, %v788_v17  ;;  %v2147_v63 = vmul.f32 %v1901_v35, %v982_v1 }
 0x104   : > { %2667 = vst [vmem:[#allocation9_spill] sm:$0xff] %v2125_v13  ;;  %2668 = vst [vmem:[#allocation10_spill] sm:$0xff] %v2131_v59  ;;  %v2151_v22 = vcombine.high %v2133_v45, %v2133_v45  ;;  %v578_v2 = vrot.slane %v2133_v45, %v1874_v26  ;;  %v772_v62 = vrot.slane %v2133_v45, %v1876_v27 }
 0x105   : > { %2670 = vst [vmem:[#allocation12_spill] sm:$0xff] %v2136_v8  ;;  %2671 = vst [vmem:[#allocation13_spill] sm:$0xff] %v2139_v3  ;;  %v2674_v17 = vrot.slane %v1957_v57, %v1874_v26  ;;  %v2675_v55 = vrot.slane %v1905_v37, %v1876_v27  ;;  %v2676_v15 = vrot.slane %v1918_v41, %v1876_v27 }
 0x106   : > { %2672 = vst [vmem:[#allocation14_spill] sm:$0xff] %v2142_v40  ;;  %2673 = vst [vmem:[#allocation15_spill] sm:$0xff] %v2147_v63  ;;  %v2677_v3 = vrot.slane %v1946_v53, %v1876_v27  ;;  %v2174_v52 = vmul.f32 %v578_v2, %v1887_v31  ;;  %v898_v2 = vrot.slane %v1918_v41, %v1878_v28 }
 0x107   : > { %v634_v40 = vmul.f32 %v2674_v17, %v1887_v31  ;;  %v825_v1 = vmul.f32 %v1894_v33, %v2675_v55  ;;  %v826_v63 = vmul.f32 %v1894_v33, %v2676_v15  ;;  %v966_v17 = vrot.slane %v2133_v45, %v1878_v28 }
 0x108   : > { %v827_v54 = vmul.f32 %v1894_v33, %v2677_v3  ;;  %2678 = vst [vmem:[#allocation16_spill] sm:$0xff] %v2174_v52  ;;  %v2679_v55 = vrot.slane %v1957_v57, %v1876_v27  ;;  %v906_v52 = vrot.slane %v1957_v57, %v1878_v28  ;;  %v2680_v59 = vrot.slane %v1905_v37, %v1878_v28 }
 0x109   : > { %v857_v15 = vadd.f32 %v825_v1, %v1960_v58  ;;  %v858_v6 = vadd.f32 %v826_v63, %v1995_v9  ;;  %v1020_v63 = vmul.f32 %v1901_v35, %v898_v2  ;;  %v1092_v9 = vrot.slane %v1918_v41, %v1880_v29  ;;  %v2215_v2 = vld [vmem:[%s2651_s3 + $0xc] sm:$0xf] }
 0x10a   : > { %v828_v49 = vmul.f32 %v1894_v33, %v2679_v55  ;;  %v859_v3 = vadd.f32 %v827_v54, %v2004_v12  ;;  %v1019_v45 = vmul.f32 %v1901_v35, %v2680_v59  ;;  %v2681_v55 = vrot.slane %v1946_v53, %v1878_v28  ;;  %v2206_v54 = vpop.f32.mrf.mxu0 }
 0x10b   : > { %v1096_v12 = vrot.slane %v1946_v53, %v1880_v29  ;;  %v2209_v59 = vmul.f32 %v1894_v33, %v772_v62  ;;  %v1052_v41 = vadd.f32 %v1020_v63, %v858_v6  ;;  %v2683_v53 = vrot.slane %v1905_v37, %v1880_v29 }
 0x10c   : > { %v860_v8 = vadd.f32 %v828_v49, %v634_v40  ;;  %v1021_v58 = vmul.f32 %v1901_v35, %v2681_v55  ;;  %v1100_v49 = vrot.slane %v1957_v57, %v1880_v29  ;;  %v1022_v40 = vmul.f32 %v1901_v35, %v906_v52 }
 0x10d   : > { %2682 = vst [vmem:[#allocation17_spill] sm:$0xff] %v2209_v59  ;;  %v1051_v1 = vadd.f32 %v1019_v45, %v857_v15  ;;  %v1213_v57 = vmul.f32 %v2215_v2, %v2683_v53  ;;  %v1214_v13 = vmul.f32 %v2215_v2, %v1092_v9  ;;  %v1215_v62 = vmul.f32 %v2215_v2, %v1096_v12 }
 0x10e   : > { %v1053_v55 = vadd.f32 %v1021_v58, %v859_v3  ;;  %v2224_v59 = vmul.f32 %v1901_v35, %v966_v17  ;;  %v1054_v45 = vadd.f32 %v1022_v40, %v860_v8  ;;  %v1216_v52 = vmul.f32 %v2215_v2, %v1100_v49 }
 0x10f   : > { %v618_v15 = vrot.slane %v2206_v54, %v1874_v26  ;;  %v1245_v3 = vadd.f32 %v1213_v57, %v1051_v1  ;;  %v1246_v6 = vadd.f32 %v1214_v13, %v1052_v41  ;;  %v2231_v37 = vcombine.high %v2206_v54, %v2206_v54  ;;  %v2251_v57 = vpop.f32.mrf.mxu0 }
 0x110   : > { %v1247_v58 = vadd.f32 %v1215_v62, %v1053_v55  ;;  %v1248_v63 = vadd.f32 %v1216_v52, %v1054_v45  ;;  %v812_v9 = vrot.slane %v2206_v54, %v1876_v27  ;;  %v1006_v17 = vrot.slane %v2206_v54, %v1878_v28 }
 0x111   : > { %v526_v8 = vrot.slane %v1909_v38, %v1874_v26  ;;  %v1309_v12 = vcombine.low %v1245_v3, %v1246_v6  ;;  %v2240_v49 = vmul.f32 %v618_v15, %v1887_v31  ;;  %v534_v40 = vrot.slane %v1942_v51, %v1874_v26 }
 0x112   : > { %v1310_v1 = vcombine.low %v1247_v58, %v1248_v63  ;;  %v720_v41 = vrot.slane %v1909_v38, %v1876_v27  ;;  %v728_v53 = vrot.slane %v1942_v51, %v1876_v27  ;;  %v861_v45 = vadd.f32 %v1921_v42, %v1912_v39 }
 0x113   : > { %v636_v55 = vmul.f32 %v526_v8, %v1887_v31  ;;  %v638_v62 = vmul.f32 %v534_v40, %v1887_v31  ;;  %v863_v52 = vadd.f32 %v1965_v60, %v1953_v56  ;;  %v914_v15 = vrot.slane %v1909_v38, %v1878_v28 }
 0x114   : > { %v1341_v3 = vpack.c.bf16 %v1310_v1, %v1309_v12  ;;  %v830_v6 = vmul.f32 %v1894_v33, %v720_v41  ;;  %v832_v58 = vmul.f32 %v1894_v33, %v728_v53  ;;  %v922_v63 = vrot.slane %v1942_v51, %v1878_v28  ;;  %v2272_v41 = vpop.f32.mrf.mxu0 }
 0x115   : > { %v1024_v8 = vmul.f32 %v1901_v35, %v914_v15  ;;  %v1055_v40 = vadd.f32 %v1924_v43, %v861_v45  ;;  %v1057_v39 = vadd.f32 %v1968_v61, %v863_v52  ;;  %v1108_v42 = vrot.slane %v1909_v38, %v1880_v29 }
 0x116   : > { %1716 = vmatprep.mubr.bf16.mxu1 %v1341_v3  ;;  %v862_v56 = vadd.f32 %v830_v6, %v636_v55  ;;  %v864_v60 = vadd.f32 %v832_v58, %v638_v62  ;;  %v1026_v12 = vmul.f32 %v1901_v35, %v922_v63  ;;  %v1116_v1 = vrot.slane %v1942_v51, %v1880_v29 }
 0x117   : > { %v2275_v53 = vmul.f32 %v1894_v33, %v812_v9  ;;  %v2684_v43 = vrot.slane %v1882_v30, %v1880_v29  ;;  %v1218_v38 = vmul.f32 %v2215_v2, %v1108_v42  ;;  %v2685_v55 = vrot.slane %v1930_v46, %v1880_v29  ;;  %v442_v42 = vpop.f32.mrf.mxu0 }
 0x118   : > { %v1056_v45 = vadd.f32 %v1024_v8, %v862_v56  ;;  %v1058_v52 = vadd.f32 %v1026_v12, %v864_v60  ;;  %v1220_v51 = vmul.f32 %v2215_v2, %v1116_v1  ;;  %v602_v9 = vrot.slane %v2251_v57, %v1874_v26 }
 0x119   : > { %v1217_v61 = vmul.f32 %v2215_v2, %v2684_v43  ;;  %v1219_v62 = vmul.f32 %v2215_v2, %v2685_v55  ;;  %v2290_v15 = vmul.f32 %v1901_v35, %v1006_v17  ;;  %v2294_v30 = vcombine.high %v2251_v57, %v2251_v57 }
 0x11a   : > { %v796_v3 = vrot.slane %v2251_v57, %v1876_v27  ;;  %v990_v46 = vrot.slane %v2251_v57, %v1878_v28  ;;  %v1250_v58 = vadd.f32 %v1218_v38, %v1056_v45  ;;  %v1252_v8 = vadd.f32 %v1220_v51, %v1058_v52 }
 0x11b   : > { %v1249_v6 = vadd.f32 %v1217_v61, %v1055_v40  ;;  %v1251_v63 = vadd.f32 %v1219_v62, %v1057_v39  ;;  %v2301_v56 = vmul.f32 %v602_v9, %v1887_v31  ;;  %v626_v12 = vrot.slane %v2272_v41, %v1874_v26 }
 0x11c   : > { %v2304_v17 = vmul.f32 %v1894_v33, %v796_v3  ;;  %v2311_v40 = vmul.f32 %v1901_v35, %v990_v46  ;;  %v820_v39 = vrot.slane %v2272_v41, %v1876_v27  ;;  %v2317_v61 = vcombine.high %v2272_v41, %v2272_v41 }
 0x11d   : > { %v1311_v1 = vcombine.low %v1249_v6, %v1250_v58  ;;  %v1312_v43 = vcombine.low %v1251_v63, %v1252_v8  ;;  %v2321_v55 = vcombine.high %v442_v42, %v442_v42  ;;  %v610_v62 = vrot.slane %v442_v42, %v1874_v26 }
 0x11e   : > { %v2325_v52 = vmul.f32 %v626_v12, %v1887_v31  ;;  %v2328_v51 = vmul.f32 %v1894_v33, %v820_v39  ;;  %v804_v9 = vrot.slane %v442_v42, %v1876_v27  ;;  %v998_v58 = vrot.slane %v442_v42, %v1878_v28 }
 0x11f   : > { %v1342_v45 = vpack.c.bf16 %v1312_v43, %v1311_v1  ;;  %v657_v46 = vmul.f32 %v610_v62, %v1887_v31  ;;  %v1192_v12 = vrot.slane %v442_v42, %v1880_v29  ;;  %v542_v1 = vrot.slane %v2021_v19, %v1874_v26 }
 0x120   : > { %v851_v63 = vmul.f32 %v1894_v33, %v804_v9  ;;  %v1045_v43 = vmul.f32 %v1901_v35, %v998_v58  ;;  %v550_v39 = vrot.slane %v2067_v4, %v1874_v26  ;;  %v736_v62 = vrot.slane %v2021_v19, %v1876_v27 }
 0x121   : > { %1717 = vmatmul.mubr.bf16.vlgmr.msra.gmra.mxu1 %v1342_v45  ;;  %v744_v45 = vrot.slane %v2067_v4, %v1876_v27  ;;  %v2351_v13 = vmul.f32 %v2215_v2, %v1192_v12  ;;  %v640_v42 = vmul.f32 %v542_v1, %v1887_v31  ;;  %v865_v38 = vadd.f32 %v2033_v24, %v2030_v23 }
 0x122   : > { %v883_v9 = vadd.f32 %v851_v63, %v657_v46  ;;  %v642_v58 = vmul.f32 %v550_v39, %v1887_v31  ;;  %v834_v60 = vmul.f32 %v1894_v33, %v736_v62  ;;  %v867_v6 = vadd.f32 %v2079_v21, %v2076_v20 }
 0x123   : > { %v836_v8 = vmul.f32 %v1894_v33, %v744_v45  ;;  %v930_v46 = vrot.slane %v2021_v19, %v1878_v28  ;;  %v938_v63 = vrot.slane %v2067_v4, %v1878_v28  ;;  %v1059_v12 = vadd.f32 %v2044_v36, %v865_v38 }
 0x124   : > { %v2361_v3 = vadd.f32 %v1045_v43, %v883_v9  ;;  %v866_v23 = vadd.f32 %v834_v60, %v640_v42  ;;  %v1061_v1 = vadd.f32 %v2090_v25, %v867_v6  ;;  %v1124_v39 = vrot.slane %v2021_v19, %v1880_v29 }
 0x125   : > { %v868_v24 = vadd.f32 %v836_v8, %v642_v58  ;;  %v1028_v62 = vmul.f32 %v1901_v35, %v930_v46  ;;  %v1030_v20 = vmul.f32 %v1901_v35, %v938_v63  ;;  %v1132_v21 = vrot.slane %v2067_v4, %v1880_v29 }
 0x126   : > { %v2686_v43 = vrot.slane %v1990_v7, %v1880_v29  ;;  %v1222_v36 = vmul.f32 %v2215_v2, %v1124_v39  ;;  %v2687_v25 = vrot.slane %v2041_v34, %v1880_v29  ;;  %v558_v19 = vrot.slane %v1986_v5, %v1874_v26 }
 0x127   : > { %v566_v38 = vrot.slane %v2039_v32, %v1874_v26  ;;  %v1060_v6 = vadd.f32 %v1028_v62, %v866_v23  ;;  %v1062_v4 = vadd.f32 %v1030_v20, %v868_v24  ;;  %v1224_v8 = vmul.f32 %v2215_v2, %v1132_v21 }
 0x128   : > { %v1221_v45 = vmul.f32 %v2215_v2, %v2686_v43  ;;  %v1223_v60 = vmul.f32 %v2215_v2, %v2687_v25  ;;  %v644_v42 = vmul.f32 %v558_v19, %v1887_v31  ;;  %v752_v34 = vrot.slane %v1986_v5, %v1876_v27 }
 0x129   : > { %v646_v58 = vmul.f32 %v566_v38, %v1887_v31  ;;  %v1254_v46 = vadd.f32 %v1222_v36, %v1060_v6  ;;  %v1256_v63 = vadd.f32 %v1224_v8, %v1062_v4  ;;  %v760_v39 = vrot.slane %v2039_v32, %v1876_v27 }
 0x12a   : > { %v1253_v7 = vadd.f32 %v1221_v45, %v1059_v12  ;;  %v1255_v9 = vadd.f32 %v1223_v60, %v1061_v1  ;;  %v869_v23 = vadd.f32 %v2001_v11, %v1998_v10  ;;  %v838_v24 = vmul.f32 %v1894_v33, %v752_v34 }
 0x12b   : > { %v871_v12 = vadd.f32 %v2050_v48, %v2047_v44  ;;  %v946_v1 = vrot.slane %v1986_v5, %v1878_v28  ;;  %v954_v62 = vrot.slane %v2039_v32, %v1878_v28  ;;  %v840_v43 = vmul.f32 %v1894_v33, %v760_v39 }
 0x12c   : > { %v1313_v20 = vcombine.low %v1253_v7, %v1254_v46  ;;  %v1314_v21 = vcombine.low %v1255_v9, %v1256_v63  ;;  %v1063_v45 = vadd.f32 %v2009_v14, %v869_v23  ;;  %v870_v36 = vadd.f32 %v838_v24, %v644_v42  ;;  %v2690_v24 = vld [vmem:[#allocation9_spill] sm:$0xff] }
 0x12d   : > { %v1032_v10 = vmul.f32 %v1901_v35, %v946_v1  ;;  %v1034_v11 = vmul.f32 %v1901_v35, %v954_v62  ;;  %v1065_v25 = vadd.f32 %v2055_v50, %v871_v12  ;;  %v872_v48 = vadd.f32 %v840_v43, %v646_v58  ;;  %v2691_v1 = vld [vmem:[#allocation16_spill] sm:$0xff]  ;;  %v2692_v62 = vld [vmem:[#allocation17_spill] sm:$0xff] }
 0x12e   : > { %v1343_v44 = vpack.c.bf16 %v1314_v21, %v1313_v20  ;;  %v1140_v60 = vrot.slane %v1986_v5, %v1880_v29  ;;  %v1148_v19 = vrot.slane %v2039_v32, %v1880_v29  ;;  %v2688_v6 = vrot.slane %v1974_v0, %v1880_v29 }
 0x12f   : > { %v1064_v38 = vadd.f32 %v1032_v10, %v870_v36  ;;  %v2689_v4 = vrot.slane %v2017_v18, %v1880_v29  ;;  %v574_v50 = vrot.slane %v2113_v16, %v1874_v26  ;;  %v1066_v7 = vadd.f32 %v1034_v11, %v872_v48 }
 0x130   : > { %v1225_v14 = vmul.f32 %v2215_v2, %v2688_v6  ;;  %1720 = vmatprep.mubr.bf16.mxu1 %v1343_v44  ;;  %v1226_v5 = vmul.f32 %v2215_v2, %v1140_v60  ;;  %v1228_v32 = vmul.f32 %v2215_v2, %v1148_v19  ;;  %v582_v9 = vrot.slane %v2151_v22, %v1874_v26  ;;  %v2693_v44 = vld [vmem:[#allocation12_spill] sm:$0xff] }
 0x131   : > { %v1227_v8 = vmul.f32 %v2215_v2, %v2689_v4  ;;  %v648_v58 = vmul.f32 %v574_v50, %v1887_v31  ;;  %v768_v18 = vrot.slane %v2113_v16, %v1876_v27  ;;  %v776_v39 = vrot.slane %v2151_v22, %v1876_v27 }
 0x132   : > { %v1257_v0 = vadd.f32 %v1225_v14, %v1063_v45  ;;  %v1258_v34 = vadd.f32 %v1226_v5, %v1064_v38  ;;  %v1260_v46 = vadd.f32 %v1228_v32, %v1066_v7  ;;  %v650_v63 = vmul.f32 %v582_v9, %v1887_v31  ;;  %v2696_v5 = vld [vmem:[#allocation11_spill] sm:$0xff] }
 0x133   : > { %v1259_v42 = vadd.f32 %v1227_v8, %v1065_v25  ;;  %v842_v23 = vmul.f32 %v1894_v33, %v768_v18  ;;  %v873_v12 = vadd.f32 %v2690_v24, %v2122_v47  ;;  %v875_v20 = vadd.f32 %v2692_v62, %v2691_v1  ;;  %v2694_v8 = vld [vmem:[#allocation4_spill] sm:$0xff] }
 0x134   : > { %v962_v21 = vrot.slane %v2113_v16, %v1878_v28  ;;  %v1315_v43 = vcombine.low %v1257_v0, %v1258_v34  ;;  %v844_v36 = vmul.f32 %v1894_v33, %v776_v39  ;;  %v970_v10 = vrot.slane %v2151_v22, %v1878_v28 }
 0x135   : > { %v1316_v45 = vcombine.low %v1259_v42, %v1260_v46  ;;  %v874_v11 = vadd.f32 %v842_v23, %v648_v58  ;;  %v1067_v48 = vadd.f32 %v2693_v44, %v873_v12  ;;  %v1069_v47 = vadd.f32 %v2224_v59, %v875_v20  ;;  %v2699_v58 = vld [vmem:[#allocation10_spill] sm:$0xff]  ;;  %v2700_v20 = vld [vmem:[#allocation5_spill] sm:$0xff] }
 0x136   : > { %v1036_v25 = vmul.f32 %v1901_v35, %v962_v21  ;;  %v876_v19 = vadd.f32 %v844_v36, %v650_v63  ;;  %v1038_v38 = vmul.f32 %v1901_v35, %v970_v10  ;;  %v1156_v6 = vrot.slane %v2113_v16, %v1880_v29  ;;  %v2698_v16 = vld [vmem:[#allocation3_spill] sm:$0xff]  ;;  %v2701_v21 = vld [vmem:[#allocation6_spill] sm:$0xff] }
 0x137   : > { %v1344_v60 = vpack.c.bf16 %v1316_v45, %v1315_v43  ;;  %v1164_v4 = vrot.slane %v2151_v22, %v1880_v29  ;;  %v2695_v50 = vrot.slane %v2694_v8, %v1880_v29  ;;  %v2697_v32 = vrot.slane %v2696_v5, %v1880_v29  ;;  %v2702_v45 = vld [vmem:[#allocation13_spill] sm:$0xff]  ;;  %v2703_v36 = vld [vmem:[#allocation14_spill] sm:$0xff] }
 0x138   : > { %v1068_v14 = vadd.f32 %v1036_v25, %v874_v11  ;;  %v1070_v9 = vadd.f32 %v1038_v38, %v876_v19  ;;  %v1230_v0 = vmul.f32 %v2215_v2, %v1156_v6  ;;  %v590_v42 = vrot.slane %v2698_v16, %v1874_v26  ;;  %v2704_v19 = vld [vmem:[#allocation7_spill] sm:$0xff] }
 0x139   : > { %v1229_v7 = vmul.f32 %v2215_v2, %v2695_v50  ;;  %v1231_v59 = vmul.f32 %v2215_v2, %v2697_v32  ;;  %1721 = vmatmul.mubr.bf16.gmra.mxu1 %v1344_v60  ;;  %v598_v22 = vrot.slane %v2699_v58, %v1874_v26  ;;  %v1232_v18 = vmul.f32 %v2215_v2, %v1164_v4  ;;  %v2705_v6 = vld [vmem:[#allocation15_spill] sm:$0xff] }
 0x13a   : > { %v784_v63 = vrot.slane %v2698_v16, %v1876_v27  ;;  %v1262_v39 = vadd.f32 %v1230_v0, %v1068_v14  ;;  %v652_v23 = vmul.f32 %v590_v42, %v1887_v31  ;;  %v792_v12 = vrot.slane %v2699_v58, %v1876_v27  ;;  %v2708_v42 = vld [vmem:[#allocation8_spill] sm:$0xff] }
 0x13b   : > { %v1261_v34 = vadd.f32 %v1229_v7, %v1067_v48  ;;  %v1263_v46 = vadd.f32 %v1231_v59, %v1069_v47  ;;  %v654_v24 = vmul.f32 %v598_v22, %v1887_v31  ;;  %v1264_v1 = vadd.f32 %v1232_v18, %v1070_v9  ;;  %v2706_v59 = vld [vmem:[#allocation2_spill] sm:$0xff] }
 0x13c   : > { %v846_v62 = vmul.f32 %v1894_v33, %v784_v63  ;;  %v877_v43 = vadd.f32 %v2701_v21, %v2700_v20  ;;  %v879_v10 = vadd.f32 %v2703_v36, %v2702_v45  ;;  %v848_v25 = vmul.f32 %v1894_v33, %v792_v12 }
 0x13d   : > { %v1317_v11 = vcombine.low %v1261_v34, %v1262_v39  ;;  %v978_v44 = vrot.slane %v2698_v16, %v1878_v28  ;;  %v986_v48 = vrot.slane %v2699_v58, %v1878_v28  ;;  %v1318_v47 = vcombine.low %v1263_v46, %v1264_v1 }
 0x13e   : > { %v878_v60 = vadd.f32 %v846_v62, %v652_v23  ;;  %v1071_v38 = vadd.f32 %v2704_v19, %v877_v43  ;;  %v1073_v14 = vadd.f32 %v2705_v6, %v879_v10  ;;  %v880_v4 = vadd.f32 %v848_v25, %v654_v24 }
 0x13f   : > { %v1040_v8 = vmul.f32 %v1901_v35, %v978_v44  ;;  %v1042_v50 = vmul.f32 %v1901_v35, %v986_v48  ;;  %v1172_v7 = vrot.slane %v2698_v16, %v1880_v29  ;;  %v1345_v5 = vpack.c.bf16 %v1318_v47, %v1317_v11 }
 0x140   : > { %v1180_v32 = vrot.slane %v2699_v58, %v1880_v29  ;;  %v2707_v9 = vrot.slane %v2706_v59, %v1880_v29  ;;  %v2709_v22 = vrot.slane %v2708_v42, %v1880_v29  ;;  %v606_v16 = vrot.slane %v2294_v30, %v1874_v26 }
 0x141   : > { %v1072_v34 = vadd.f32 %v1040_v8, %v878_v60  ;;  %v1074_v46 = vadd.f32 %v1042_v50, %v880_v4  ;;  %v1234_v63 = vmul.f32 %v2215_v2, %v1172_v7  ;;  %1724 = vmatprep.mubr.bf16.mxu1 %v1345_v5  ;;  %v2710_v24 = vrot.slane %v2321_v55, %v1874_v26 }
 0x142   : > { %v1233_v0 = vmul.f32 %v2215_v2, %v2707_v9  ;;  %v1235_v18 = vmul.f32 %v2215_v2, %v2709_v22  ;;  %v1236_v58 = vmul.f32 %v2215_v2, %v1180_v32  ;;  %v656_v62 = vmul.f32 %v606_v16, %v1887_v31 }
 0x143   : > { %v658_v12 = vmul.f32 %v2710_v24, %v1887_v31  ;;  %v1266_v1 = vadd.f32 %v1234_v63, %v1072_v34  ;;  %v800_v20 = vrot.slane %v2294_v30, %v1876_v27  ;;  %v2711_v21 = vrot.slane %v2321_v55, %v1876_v27 }
 0x144   : > { %v1265_v39 = vadd.f32 %v1233_v0, %v1071_v38  ;;  %v1267_v23 = vadd.f32 %v1235_v18, %v1073_v14  ;;  %v1268_v45 = vadd.f32 %v1236_v58, %v1074_v46  ;;  %v881_v36 = vadd.f32 %v2304_v17, %v2301_v56 }
 0x145   : > { %v852_v43 = vmul.f32 %v1894_v33, %v2711_v21  ;;  %v994_v10 = vrot.slane %v2294_v30, %v1878_v28  ;;  %v2712_v11 = vrot.slane %v2321_v55, %v1878_v28  ;;  %v850_v48 = vmul.f32 %v1894_v33, %v800_v20 }
 0x146   : > { %v1319_v44 = vcombine.low %v1265_v39, %v1266_v1  ;;  %v1188_v60 = vrot.slane %v2294_v30, %v1880_v29  ;;  %v1320_v19 = vcombine.low %v1267_v23, %v1268_v45  ;;  %v1075_v56 = vadd.f32 %v2311_v40, %v881_v36 }
 0x147   : > { %v1046_v25 = vmul.f32 %v1901_v35, %v2712_v11  ;;  %v884_v47 = vadd.f32 %v852_v43, %v658_v12  ;;  %v1044_v38 = vmul.f32 %v1901_v35, %v994_v10  ;;  %v1196_v17 = vrot.slane %v2321_v55, %v1880_v29 }
 0x148   : > { %v882_v6 = vadd.f32 %v850_v48, %v656_v62  ;;  %v2713_v4 = vrot.slane %v2251_v57, %v1880_v29  ;;  %v1238_v50 = vmul.f32 %v2215_v2, %v1188_v60  ;;  %v1346_v7 = vpack.c.bf16 %v1320_v19, %v1319_v44  ;;  %v1368_v48 = vld [vmem:[%s2652_s4 + $0x18] sm:$0xff]  ;;  %v1366_v19 = vld [vmem:[%s2652_s4 + $0x8] sm:$0xff] }
 0x149   : > { %v1078_v14 = vadd.f32 %v1046_v25, %v884_v47  ;;  %v1240_v30 = vmul.f32 %v2215_v2, %v1196_v17  ;;  %v1271_v5 = vadd.f32 %v2351_v13, %v2361_v3  ;;  %v622_v40 = vrot.slane %v2231_v37, %v1874_v26  ;;  %v1367_v25 = vld [vmem:[%s2652_s4 + $0x10] sm:$0xff] }
 0x14a   : > { %v1237_v8 = vmul.f32 %v2215_v2, %v2713_v4  ;;  %v1076_v32 = vadd.f32 %v1044_v38, %v882_v6  ;;  %v630_v59 = vrot.slane %v2317_v61, %v1874_v26  ;;  %v816_v57 = vrot.slane %v2231_v37, %v1876_v27  ;;  %1725 = vmatmul.mubr.bf16.gmra.mxu1 %v1346_v7  ;;  %v1371_v6 = vld [vmem:[%s2652_s4 + $0x30] sm:$0xff]  ;;  %v1369_v4 = vld [vmem:[%s2652_s4 + $0x20] sm:$0xff]  ;;  %v1372_v7 = vld [vmem:[%s2652_s4 + $0x38] sm:$0xff] }
 0x14b   : > { %v1272_v9 = vadd.f32 %v1240_v30, %v1078_v14  ;;  %v660_v0 = vmul.f32 %v622_v40, %v1887_v31  ;;  %v824_v42 = vrot.slane %v2317_v61, %v1876_v27  ;;  %v885_v13 = vadd.f32 %v2275_v53, %v2240_v49  ;;  %v1370_v40 = vld [vmem:[%s2652_s4 + $0x28] sm:$0xff] }
 0x14c   : > { %v1269_v55 = vadd.f32 %v1237_v8, %v1075_v56  ;;  %v1270_v3 = vadd.f32 %v1238_v50, %v1076_v32  ;;  %v662_v22 = vmul.f32 %v630_v59, %v1887_v31  ;;  %v854_v18 = vmul.f32 %v1894_v33, %v816_v57  ;;  %v1375_v57 = vld [vmem:[%s2652_s4 + $0x50] sm:$0xff] }
 0x14d   : > { %v887_v26 = vadd.f32 %v2328_v51, %v2325_v52  ;;  %v1322_v34 = vcombine.low %v1271_v5, %v1272_v9  ;;  %v856_v46 = vmul.f32 %v1894_v33, %v824_v42  ;;  %v1010_v63 = vrot.slane %v2231_v37, %v1878_v28 }
 0x14e   : > { %v1018_v27 = vrot.slane %v2317_v61, %v1878_v28  ;;  %v2714_v49 = vrot.slane %v2272_v41, %v1878_v28  ;;  %v1208_v31 = vrot.slane %v2272_v41, %v1880_v29  ;;  %v1321_v16 = vcombine.low %v1269_v55, %v1270_v3  ;;  %v1376_v3 = vld [vmem:[%s2652_s4 + $0x58] sm:$0xff] }
 0x14f   : > { %v886_v58 = vadd.f32 %v854_v18, %v660_v0  ;;  %v888_v52 = vadd.f32 %v856_v46, %v662_v22  ;;  %v1048_v51 = vmul.f32 %v1901_v35, %v1010_v63  ;;  %v1204_v39 = vrot.slane %v2231_v37, %v1880_v29  ;;  %v1373_v0 = vld [vmem:[%s2652_s4 + $0x40] sm:$0xff] }
 0x150   : > { %v1049_v53 = vmul.f32 %v1901_v35, %v2714_v49  ;;  %v1050_v33 = vmul.f32 %v1901_v35, %v1018_v27  ;;  %v1347_v23 = vpack.c.bf16 %v1322_v34, %v1321_v16  ;;  %v1079_v24 = vadd.f32 %v2290_v15, %v885_v13  ;;  %v1379_v27 = vld [vmem:[%s2652_s4 + $0x70] sm:$0xff] }
 0x151   : > { %v1212_v28 = vrot.slane %v2317_v61, %v1880_v29  ;;  %v1080_v1 = vadd.f32 %v1048_v51, %v886_v58  ;;  %v1242_v62 = vmul.f32 %v2215_v2, %v1204_v39  ;;  %v2715_v20 = vrot.slane %v2206_v54, %v1880_v29  ;;  %v1365_v54 = vld [vmem:[%s2652_s4] sm:$0xff]  ;;  %v1380_v58 = vld [vmem:[%s2652_s4 + $0x78] sm:$0xff] }
 0x152   : > { %v1081_v12 = vadd.f32 %v1049_v53, %v887_v26  ;;  %v1082_v41 = vadd.f32 %v1050_v33, %v888_v52  ;;  %1728 = vmatprep.mubr.bf16.mxu1 %v1347_v23  ;;  %v1243_v37 = vmul.f32 %v2215_v2, %v1208_v31  ;;  %v1374_v26 = vld [vmem:[%s2652_s4 + $0x48] sm:$0xff]  ;;  %v1377_v53 = vld [vmem:[%s2652_s4 + $0x60] sm:$0xff] }
 0x153   : > { %v1241_v35 = vmul.f32 %v2215_v2, %v2715_v20  ;;  %v1244_v21 = vmul.f32 %v2215_v2, %v1212_v28  ;;  %v1274_v15 = vadd.f32 %v1242_v62, %v1080_v1  ;;  %v1378_v33 = vld [vmem:[%s2652_s4 + $0x68] sm:$0xff] }
 0x154   : > { %v1275_v45 = vadd.f32 %v1243_v37, %v1081_v12 }
 0x155   : > { %v1273_v43 = vadd.f32 %v1241_v35, %v1079_v24  ;;  %v1276_v36 = vadd.f32 %v1244_v21, %v1082_v41 }
 0x157   : > { %v1323_v61 = vcombine.low %v1273_v43, %v1274_v15  ;;  %v1324_v10 = vcombine.low %v1275_v45, %v1276_v36 }
 0x159   : > { %v1348_v11 = vpack.c.bf16 %v1324_v10, %v1323_v61 }
 0x15b   : > { %1729 = vmatmul.mubr.bf16.gmra.mxu1 %v1348_v11 }
 0x1e1   : > { %v1718_v29 = vpop.f32.mrf.mxu1 }
 0x1e2   : > { %v1472_v2 = vadd.f32 %v1718_v29, %v1367_v25 }
 0x1e3   : > { %v1463_v44 = vpop.f32.mrf.mxu1 }
 0x1e4   : > { %1528 = vst [vmem:[%s2582_s24 + $0x10] sm:$0xff] %v1472_v2  ;;  %v1464_v47 = vadd.f32 %v1463_v44, %v1365_v54 }
 0x1e5   : > { %v1719_v60 = vpop.f32.mrf.mxu1 }
 0x1e6   : > { %1526 = vst [vmem:[%s2582_s24] sm:$0xff] %v1464_v47  ;;  %v1475_v38 = vadd.f32 %v1719_v60, %v1368_v48 }
 0x1e7   : > { %v1466_v56 = vpop.f32.mrf.mxu1 }
 0x1e8   : > { %1529 = vst [vmem:[%s2582_s24 + $0x18] sm:$0xff] %v1475_v38  ;;  %v1467_v17 = vadd.f32 %v1466_v56, %v1366_v19 }
 0x1ea   : > { %1527 = vst [vmem:[%s2582_s24 + $0x8] sm:$0xff] %v1467_v17 }
 0x1f9   : > { %v1722_v14 = vpop.f32.mrf.mxu1 }
 0x1fa   : > { %v1488_v8 = vadd.f32 %v1722_v14, %v1371_v6 }
 0x1fb   : > { %v1479_v50 = vpop.f32.mrf.mxu1 }
 0x1fc   : > { %1532 = vst [vmem:[%s2582_s24 + $0x30] sm:$0xff] %v1488_v8  ;;  %v1480_v30 = vadd.f32 %v1479_v50, %v1369_v4 }
 0x1fd   : > { %v1723_v5 = vpop.f32.mrf.mxu1 }
 0x1fe   : > { %1530 = vst [vmem:[%s2582_s24 + $0x20] sm:$0xff] %v1480_v30  ;;  %v1491_v32 = vadd.f32 %v1723_v5, %v1372_v7 }
 0x1ff   : > { %v1482_v55 = vpop.f32.mrf.mxu1 }
 0x200   : > { %1533 = vst [vmem:[%s2582_s24 + $0x38] sm:$0xff] %v1491_v32  ;;  %v1483_v59 = vadd.f32 %v1482_v55, %v1370_v40 }
 0x202   : > { %1531 = vst [vmem:[%s2582_s24 + $0x28] sm:$0xff] %v1483_v59 }
 0x20a   : > { %v1726_v9 = vpop.f32.mrf.mxu1 }
 0x20b   : > { %v1504_v42 = vadd.f32 %v1726_v9, %v1375_v57 }
 0x20c   : > { %v1495_v13 = vpop.f32.mrf.mxu1 }
 0x20d   : > { %1536 = vst [vmem:[%s2582_s24 + $0x50] sm:$0xff] %v1504_v42  ;;  %v1496_v22 = vadd.f32 %v1495_v13, %v1373_v0 }
 0x20e   : > { %v1727_v18 = vpop.f32.mrf.mxu1 }
 0x20f   : > { %1534 = vst [vmem:[%s2582_s24 + $0x40] sm:$0xff] %v1496_v22  ;;  %v1507_v34 = vadd.f32 %v1727_v18, %v1376_v3 }
 0x210   : > { %v1498_v46 = vpop.f32.mrf.mxu1 }
 0x211   : > { %1537 = vst [vmem:[%s2582_s24 + $0x58] sm:$0xff] %v1507_v34  ;;  %v1499_v63 = vadd.f32 %v1498_v46, %v1374_v26 }
 0x213   : > { %1535 = vst [vmem:[%s2582_s24 + $0x48] sm:$0xff] %v1499_v63 }
 0x21b   : > { %v1730_v49 = vpop.f32.mrf.mxu1 }
 0x21c   : > { %v1520_v31 = vadd.f32 %v1730_v49, %v1379_v27 }
 0x21d   : > { %v1511_v16 = vpop.f32.mrf.mxu1 }
 0x21e   : > { %1540 = vst [vmem:[%s2582_s24 + $0x70] sm:$0xff] %v1520_v31  ;;  %v1512_v52 = vadd.f32 %v1511_v16, %v1377_v53 }
 0x21f   : > { %v1731_v51 = vpop.f32.mrf.mxu1 }
 0x220   : > { %1538 = vst [vmem:[%s2582_s24 + $0x60] sm:$0xff] %v1512_v52  ;;  %v1523_v39 = vadd.f32 %v1731_v51, %v1380_v58 }
 0x221   : > { %v1514_v23 = vpop.f32.mrf.mxu1 }
 0x222   : > { %1541 = vst [vmem:[%s2582_s24 + $0x78] sm:$0xff] %v1523_v39  ;;  %v1515_v24 = vadd.f32 %v1514_v23, %v1378_v33 }
 0x224   : > { %1539 = vst [vmem:[%s2582_s24 + $0x68] sm:$0xff] %v1515_v24 }
 0x225 PF: > { %s15_s18 = sadd.s32 1, %s1770_s18  }
 0x226   : > { %p12_p4 = scmp.ge.s32.totalorder %s15_s18, 4  }
 0x228   :  { %14 = sbr.rel (!%p12_p4) target bundleno = 1 (0x1), region = 73 }

</bundles_post_ra>
